<compile_context>
chip_gen: v5e
topology: v5e:2x2
jax: 0.10.0
libtpu: 0.0.40
codegen_flags: <defaults>
</compile_context>

<pallas_src>
import jax
import jax.numpy as jnp
from jax.experimental import pallas as pl
from jax.experimental.pallas import tpu as pltpu


def lstm_classifier_kernel(x_ref, w_ih_ref, w_hh_ref, b_ref,
                           w_cls_ref, b_cls_ref,
                           logits_ref, hfinal_ref):
    # x_ref:      (T*B, E)   time-major, batch padded to a sublane multiple
    # w_ih_ref:   (E, 4H)    fused gate weights, PyTorch order (i, f, g, o)
    # w_hh_ref:   (H, 4H)
    # b_ref:      (1, 4H)    b_ih + b_hh combined
    # w_cls_ref:  (H, Gp)    classifier weight, lane-padded
    # b_cls_ref:  (1, Gp)
    # logits_ref: (B, Gp)
    # hfinal_ref: (B, H)
    TB, E = x_ref.shape
    B, H = hfinal_ref.shape
    T = TB // B

    w_hh = w_hh_ref[...]

    # Hoisted input projection: one well-shaped MXU matmul for all time steps.
    xp = (jnp.dot(x_ref[...], w_ih_ref[...],
                  preferred_element_type=jnp.float32)
          + b_ref[...])                                   # (T*B, 4H)

    h = jnp.zeros((B, H), jnp.float32)
    c = jnp.zeros((B, H), jnp.float32)

    # Fully unrolled static time loop (T is small and known at trace time).
    for t in range(T):
        gates = xp[t * B:(t + 1) * B, :] + jnp.dot(
            h, w_hh, preferred_element_type=jnp.float32)  # (B, 4H)
        # Activations issued back-to-back after the single fused matmul.
        i_g = jax.nn.sigmoid(gates[:, 0 * H:1 * H])
        f_g = jax.nn.sigmoid(gates[:, 1 * H:2 * H])
        g_g = jnp.tanh(gates[:, 2 * H:3 * H])
        o_g = jax.nn.sigmoid(gates[:, 3 * H:4 * H])
        c = f_g * c + i_g * g_g
        h = o_g * jnp.tanh(c)

    hfinal_ref[...] = h
    logits_ref[...] = (jnp.dot(h, w_cls_ref[...],
                               preferred_element_type=jnp.float32)
                       + b_cls_ref[...])


def lstm_forward(x_tbe, w_ih, w_hh, b, w_cls, b_cls):
    """x_tbe: (T, B, E) f32. Returns (logits (B, G), h_final (B, H))."""
    T, B, E = x_tbe.shape
    H = w_hh.shape[0]
    G = w_cls.shape[-1]

    # Pad batch to a sublane multiple (>= 8) and classifier lanes to 128.
    B_pad = max(8, ((B + 7) // 8) * 8)
    G_pad = max(128, ((G + 127) // 128) * 128)

    x_p = jnp.pad(x_tbe, ((0, 0), (0, B_pad - B), (0, 0)))
    x_p = x_p.reshape(T * B_pad, E)                       # time-major, flat
    w_cls_p = jnp.pad(w_cls, ((0, 0), (0, G_pad - G)))
    b_cls_p = jnp.pad(b_cls, ((0, 0), (0, G_pad - G)))

    vmem = pl.BlockSpec(memory_space=pltpu.MemorySpace.VMEM)
    logits_p, h_p = pl.pallas_call(
        lstm_classifier_kernel,
        out_shape=(jax.ShapeDtypeStruct((B_pad, G_pad), jnp.float32),
                   jax.ShapeDtypeStruct((B_pad, H), jnp.float32)),
        in_specs=[vmem] * 6,
        out_specs=(vmem, vmem),
    )(x_p, w_ih, w_hh, b, w_cls_p, b_cls_p)

    return logits_p[:B, :G], h_p[:B, :]


def reference_forward(x_tbe, w_ih, w_hh, b, w_cls, b_cls):
    """Pure-JAX reference (lax.scan LSTM) for correctness checking."""
    T, B, E = x_tbe.shape
    H = w_hh.shape[0]
    h0 = jnp.zeros((B, H), jnp.float32)
    c0 = jnp.zeros((B, H), jnp.float32)

    def step(carry, x):
        h, c = carry
        gates = x @ w_ih + h @ w_hh + b
        i = jax.nn.sigmoid(gates[:, 0 * H:1 * H])
        f = jax.nn.sigmoid(gates[:, 1 * H:2 * H])
        g = jnp.tanh(gates[:, 2 * H:3 * H])
        o = jax.nn.sigmoid(gates[:, 3 * H:4 * H])
        c = f * c + i * g
        h = o * jnp.tanh(c)
        return (h, c), None

    (h, c), _ = jax.lax.scan(step, (h0, c0), x_tbe)
    logits = h @ w_cls + b_cls
    return logits, h


class PallasCharLSTMClassifier:
    """JAX/Pallas port of the PyTorch Model."""

    def __init__(self, alphabet, embedding_size, hidden_size, genders,
                 num_layers=1, key=None):
        assert num_layers == 1
        self.alphabet_size = len(alphabet) + 3
        self.hidden_size = hidden_size
        self.embedding_size = embedding_size
        self.genders = genders
        self.pad_len = 15

        self.char2idx = {'<START>': 0, '<END>': 1, '<PAD>': 2}
        idx = 3
        for char in alphabet:
            self.char2idx[char] = idx
            idx += 1

        key = jax.random.PRNGKey(0) if key is None else key
        ks = jax.random.split(key, 7)
        E, H, G, V = embedding_size, hidden_size, genders, self.alphabet_size
        s = 0.1
        self.embedding = jax.random.normal(ks[0], (V, E), jnp.float32) * s
        # Fused gate weights, PyTorch gate order (i, f, g, o) concatenated on
        # the last dim.  NOTE: when loading real PyTorch LSTM weights, use
        # weight_ih_l0.T / weight_hh_l0.T and b = (bias_ih_l0 + bias_hh_l0).
        self.w_ih = jax.random.normal(ks[1], (E, 4 * H), jnp.float32) * s
        self.w_hh = jax.random.normal(ks[2], (H, 4 * H), jnp.float32) * s
        self.b = jax.random.normal(ks[3], (1, 4 * H), jnp.float32) * s
        self.w_cls = jax.random.normal(ks[4], (H, G), jnp.float32) * s
        self.b_cls = jax.random.normal(ks[5], (1, G), jnp.float32) * s

    def tokenize(self, batch):
        # mirrors the PyTorch forward's preprocessing (strings -> LongTensor)
        # TODO(synk): assumes equal-length, space-separated inputs (no PAD /
        # length masking), matching the original module's behaviour.
        words = [['<START>'] + list(word.split()) + ['<END>'] for word in batch]
        ids = [[self.char2idx[ch] for ch in word] for word in words]
        return jnp.asarray(ids, dtype=jnp.int32)   # (B, T)

    def forward(self, batch):
        ids = self.tokenize(batch)                      # (B, T)
        embed = jnp.take(self.embedding, ids, axis=0)   # (B, T, E) glue gather
        x_tbe = jnp.transpose(embed, (1, 0, 2))         # (T, B, E) time-major
        logits, h_final = lstm_forward(x_tbe, self.w_ih, self.w_hh, self.b,
                                       self.w_cls, self.b_cls)
        return logits, h_final

    def forward_reference(self, batch):
        ids = self.tokenize(batch)
        embed = jnp.take(self.embedding, ids, axis=0)
        x_tbe = jnp.transpose(embed, (1, 0, 2))
        return reference_forward(x_tbe, self.w_ih, self.w_hh, self.b,
                                 self.w_cls, self.b_cls)


if __name__ == "__main__":
    alphabet = list("abcdefghij")          # alphabet_size = 10 + 3 = 13
    embedding_size = 16
    hidden_size = 32
    genders = 2

    model = PallasCharLSTMClassifier(alphabet, embedding_size, hidden_size,
                                     genders, key=jax.random.PRNGKey(0))

    # batch of 4 "words", 6 chars each -> seq len T = 6 + 2 (START/END) = 8
    batch = [
        "a b c d e f",
        "b a d c f e",
        "g h i j a b",
        "j i h g f e",
    ]

    logits, h_final = model.forward(batch)
    logits = jax.block_until_ready(logits)
    h_final = jax.block_until_ready(h_final)

    ref_logits, ref_h = model.forward_reference(batch)
    assert jnp.allclose(logits, ref_logits, rtol=1e-4, atol=1e-5)
    assert jnp.allclose(h_final, ref_h, rtol=1e-4, atol=1e-5)

    print("KERNEL_OK")
</pallas_src>

<mosaic_0001>
module attributes {stable_mosaic.version = 11 : i64} {
  func.func @lstm_classifier_kernel(%arg0: memref<64x16xf32, #tpu.memory_space<vmem>>, %arg1: memref<16x128xf32, #tpu.memory_space<vmem>>, %arg2: memref<32x128xf32, #tpu.memory_space<vmem>>, %arg3: memref<1x128xf32, #tpu.memory_space<vmem>>, %arg4: memref<32x128xf32, #tpu.memory_space<vmem>>, %arg5: memref<1x128xf32, #tpu.memory_space<vmem>>, %arg6: memref<8x128xf32, #tpu.memory_space<vmem>>, %arg7: memref<8x32xf32, #tpu.memory_space<vmem>>) attributes {dimension_semantics = [], scalar_prefetch = 0 : i64, scratch_operands = 0 : i64, tpu.core_type = #tpu.core_type<tc>} {
    %c0 = arith.constant 0 : index
    %c0_0 = arith.constant 0 : index
    %0 = vector.load %arg2[%c0, %c0_0] : memref<32x128xf32, #tpu.memory_space<vmem>>, vector<32x128xf32>
    %c0_1 = arith.constant 0 : index
    %c0_2 = arith.constant 0 : index
    %1 = vector.load %arg0[%c0_1, %c0_2] : memref<64x16xf32, #tpu.memory_space<vmem>>, vector<64x16xf32>
    %c0_3 = arith.constant 0 : index
    %c0_4 = arith.constant 0 : index
    %2 = vector.load %arg1[%c0_3, %c0_4] : memref<16x128xf32, #tpu.memory_space<vmem>>, vector<16x128xf32>
    %cst = arith.constant dense<0.000000e+00> : vector<64x128xf32>
    %3 = tpu.matmul %1, %2, %cst {dimension_numbers = #tpu.dot_dimension_numbers<[1], [0], [0], [1], [0, 0, 1, 1], [], []>} : vector<64x16xf32>, vector<16x128xf32>, vector<64x128xf32> -> vector<64x128xf32>
    %c0_5 = arith.constant 0 : index
    %c0_6 = arith.constant 0 : index
    %4 = vector.load %arg3[%c0_5, %c0_6] : memref<1x128xf32, #tpu.memory_space<vmem>>, vector<1x128xf32>
    %5 = vector.broadcast %4 : vector<1x128xf32> to vector<64x128xf32>
    %6 = arith.addf %3, %5 : vector<64x128xf32>
    %cst_7 = arith.constant 0.000000e+00 : f32
    %7 = vector.broadcast %cst_7 : f32 to vector<8x32xf32>
    %cst_8 = arith.constant 0.000000e+00 : f32
    %8 = vector.broadcast %cst_8 : f32 to vector<8x32xf32>
    %9 = vector.extract_strided_slice %6 {offsets = [0, 0], sizes = [8, 128], strides = [1, 1]} : vector<64x128xf32> to vector<8x128xf32>
    %cst_9 = arith.constant dense<0.000000e+00> : vector<8x128xf32>
    %10 = tpu.matmul %7, %0, %cst_9 {dimension_numbers = #tpu.dot_dimension_numbers<[1], [0], [0], [1], [0, 0, 1, 1], [], []>} : vector<8x32xf32>, vector<32x128xf32>, vector<8x128xf32> -> vector<8x128xf32>
    %11 = arith.addf %9, %10 : vector<8x128xf32>
    %12 = vector.extract_strided_slice %11 {offsets = [0, 0], sizes = [8, 32], strides = [1, 1]} : vector<8x128xf32> to vector<8x32xf32>
    %13 = arith.negf %12 : vector<8x32xf32>
    %14 = math.exp %13 : vector<8x32xf32>
    %cst_10 = arith.constant 1.000000e+00 : f32
    %15 = vector.broadcast %cst_10 : f32 to vector<8x32xf32>
    %16 = arith.addf %15, %14 : vector<8x32xf32>
    %17 = arith.divf %15, %16 : vector<8x32xf32>
    %18 = vector.extract_strided_slice %11 {offsets = [0, 32], sizes = [8, 32], strides = [1, 1]} : vector<8x128xf32> to vector<8x32xf32>
    %19 = arith.negf %18 : vector<8x32xf32>
    %20 = math.exp %19 : vector<8x32xf32>
    %cst_11 = arith.constant 1.000000e+00 : f32
    %21 = vector.broadcast %cst_11 : f32 to vector<8x32xf32>
    %22 = arith.addf %21, %20 : vector<8x32xf32>
    %23 = arith.divf %21, %22 : vector<8x32xf32>
    %24 = vector.extract_strided_slice %11 {offsets = [0, 64], sizes = [8, 32], strides = [1, 1]} : vector<8x128xf32> to vector<8x32xf32>
    %25 = math.tanh %24 : vector<8x32xf32>
    %26 = vector.extract_strided_slice %11 {offsets = [0, 96], sizes = [8, 32], strides = [1, 1]} : vector<8x128xf32> to vector<8x32xf32>
    %27 = arith.negf %26 : vector<8x32xf32>
    %28 = math.exp %27 : vector<8x32xf32>
    %cst_12 = arith.constant 1.000000e+00 : f32
    %29 = vector.broadcast %cst_12 : f32 to vector<8x32xf32>
    %30 = arith.addf %29, %28 : vector<8x32xf32>
    %31 = arith.divf %29, %30 : vector<8x32xf32>
    %32 = arith.mulf %23, %8 : vector<8x32xf32>
    %33 = arith.mulf %17, %25 : vector<8x32xf32>
    %34 = arith.addf %32, %33 : vector<8x32xf32>
    %35 = math.tanh %34 : vector<8x32xf32>
    %36 = arith.mulf %31, %35 : vector<8x32xf32>
    %37 = vector.extract_strided_slice %6 {offsets = [8, 0], sizes = [8, 128], strides = [1, 1]} : vector<64x128xf32> to vector<8x128xf32>
    %cst_13 = arith.constant dense<0.000000e+00> : vector<8x128xf32>
    %38 = tpu.matmul %36, %0, %cst_13 {dimension_numbers = #tpu.dot_dimension_numbers<[1], [0], [0], [1], [0, 0, 1, 1], [], []>} : vector<8x32xf32>, vector<32x128xf32>, vector<8x128xf32> -> vector<8x128xf32>
    %39 = arith.addf %37, %38 : vector<8x128xf32>
    %40 = vector.extract_strided_slice %39 {offsets = [0, 0], sizes = [8, 32], strides = [1, 1]} : vector<8x128xf32> to vector<8x32xf32>
    %41 = arith.negf %40 : vector<8x32xf32>
    %42 = math.exp %41 : vector<8x32xf32>
    %cst_14 = arith.constant 1.000000e+00 : f32
    %43 = vector.broadcast %cst_14 : f32 to vector<8x32xf32>
    %44 = arith.addf %43, %42 : vector<8x32xf32>
    %45 = arith.divf %43, %44 : vector<8x32xf32>
    %46 = vector.extract_strided_slice %39 {offsets = [0, 32], sizes = [8, 32], strides = [1, 1]} : vector<8x128xf32> to vector<8x32xf32>
    %47 = arith.negf %46 : vector<8x32xf32>
    %48 = math.exp %47 : vector<8x32xf32>
    %cst_15 = arith.constant 1.000000e+00 : f32
    %49 = vector.broadcast %cst_15 : f32 to vector<8x32xf32>
    %50 = arith.addf %49, %48 : vector<8x32xf32>
    %51 = arith.divf %49, %50 : vector<8x32xf32>
    %52 = vector.extract_strided_slice %39 {offsets = [0, 64], sizes = [8, 32], strides = [1, 1]} : vector<8x128xf32> to vector<8x32xf32>
    %53 = math.tanh %52 : vector<8x32xf32>
    %54 = vector.extract_strided_slice %39 {offsets = [0, 96], sizes = [8, 32], strides = [1, 1]} : vector<8x128xf32> to vector<8x32xf32>
    %55 = arith.negf %54 : vector<8x32xf32>
    %56 = math.exp %55 : vector<8x32xf32>
    %cst_16 = arith.constant 1.000000e+00 : f32
    %57 = vector.broadcast %cst_16 : f32 to vector<8x32xf32>
    %58 = arith.addf %57, %56 : vector<8x32xf32>
    %59 = arith.divf %57, %58 : vector<8x32xf32>
    %60 = arith.mulf %51, %34 : vector<8x32xf32>
    %61 = arith.mulf %45, %53 : vector<8x32xf32>
    %62 = arith.addf %60, %61 : vector<8x32xf32>
    %63 = math.tanh %62 : vector<8x32xf32>
    %64 = arith.mulf %59, %63 : vector<8x32xf32>
    %65 = vector.extract_strided_slice %6 {offsets = [16, 0], sizes = [8, 128], strides = [1, 1]} : vector<64x128xf32> to vector<8x128xf32>
    %cst_17 = arith.constant dense<0.000000e+00> : vector<8x128xf32>
    %66 = tpu.matmul %64, %0, %cst_17 {dimension_numbers = #tpu.dot_dimension_numbers<[1], [0], [0], [1], [0, 0, 1, 1], [], []>} : vector<8x32xf32>, vector<32x128xf32>, vector<8x128xf32> -> vector<8x128xf32>
    %67 = arith.addf %65, %66 : vector<8x128xf32>
    %68 = vector.extract_strided_slice %67 {offsets = [0, 0], sizes = [8, 32], strides = [1, 1]} : vector<8x128xf32> to vector<8x32xf32>
    %69 = arith.negf %68 : vector<8x32xf32>
    %70 = math.exp %69 : vector<8x32xf32>
    %cst_18 = arith.constant 1.000000e+00 : f32
    %71 = vector.broadcast %cst_18 : f32 to vector<8x32xf32>
    %72 = arith.addf %71, %70 : vector<8x32xf32>
    %73 = arith.divf %71, %72 : vector<8x32xf32>
    %74 = vector.extract_strided_slice %67 {offsets = [0, 32], sizes = [8, 32], strides = [1, 1]} : vector<8x128xf32> to vector<8x32xf32>
    %75 = arith.negf %74 : vector<8x32xf32>
    %76 = math.exp %75 : vector<8x32xf32>
    %cst_19 = arith.constant 1.000000e+00 : f32
    %77 = vector.broadcast %cst_19 : f32 to vector<8x32xf32>
    %78 = arith.addf %77, %76 : vector<8x32xf32>
    %79 = arith.divf %77, %78 : vector<8x32xf32>
    %80 = vector.extract_strided_slice %67 {offsets = [0, 64], sizes = [8, 32], strides = [1, 1]} : vector<8x128xf32> to vector<8x32xf32>
    %81 = math.tanh %80 : vector<8x32xf32>
    %82 = vector.extract_strided_slice %67 {offsets = [0, 96], sizes = [8, 32], strides = [1, 1]} : vector<8x128xf32> to vector<8x32xf32>
    %83 = arith.negf %82 : vector<8x32xf32>
    %84 = math.exp %83 : vector<8x32xf32>
    %cst_20 = arith.constant 1.000000e+00 : f32
    %85 = vector.broadcast %cst_20 : f32 to vector<8x32xf32>
    %86 = arith.addf %85, %84 : vector<8x32xf32>
    %87 = arith.divf %85, %86 : vector<8x32xf32>
    %88 = arith.mulf %79, %62 : vector<8x32xf32>
    %89 = arith.mulf %73, %81 : vector<8x32xf32>
    %90 = arith.addf %88, %89 : vector<8x32xf32>
    %91 = math.tanh %90 : vector<8x32xf32>
    %92 = arith.mulf %87, %91 : vector<8x32xf32>
    %93 = vector.extract_strided_slice %6 {offsets = [24, 0], sizes = [8, 128], strides = [1, 1]} : vector<64x128xf32> to vector<8x128xf32>
    %cst_21 = arith.constant dense<0.000000e+00> : vector<8x128xf32>
    %94 = tpu.matmul %92, %0, %cst_21 {dimension_numbers = #tpu.dot_dimension_numbers<[1], [0], [0], [1], [0, 0, 1, 1], [], []>} : vector<8x32xf32>, vector<32x128xf32>, vector<8x128xf32> -> vector<8x128xf32>
    %95 = arith.addf %93, %94 : vector<8x128xf32>
    %96 = vector.extract_strided_slice %95 {offsets = [0, 0], sizes = [8, 32], strides = [1, 1]} : vector<8x128xf32> to vector<8x32xf32>
    %97 = arith.negf %96 : vector<8x32xf32>
    %98 = math.exp %97 : vector<8x32xf32>
    %cst_22 = arith.constant 1.000000e+00 : f32
    %99 = vector.broadcast %cst_22 : f32 to vector<8x32xf32>
    %100 = arith.addf %99, %98 : vector<8x32xf32>
    %101 = arith.divf %99, %100 : vector<8x32xf32>
    %102 = vector.extract_strided_slice %95 {offsets = [0, 32], sizes = [8, 32], strides = [1, 1]} : vector<8x128xf32> to vector<8x32xf32>
    %103 = arith.negf %102 : vector<8x32xf32>
    %104 = math.exp %103 : vector<8x32xf32>
    %cst_23 = arith.constant 1.000000e+00 : f32
    %105 = vector.broadcast %cst_23 : f32 to vector<8x32xf32>
    %106 = arith.addf %105, %104 : vector<8x32xf32>
    %107 = arith.divf %105, %106 : vector<8x32xf32>
    %108 = vector.extract_strided_slice %95 {offsets = [0, 64], sizes = [8, 32], strides = [1, 1]} : vector<8x128xf32> to vector<8x32xf32>
    %109 = math.tanh %108 : vector<8x32xf32>
    %110 = vector.extract_strided_slice %95 {offsets = [0, 96], sizes = [8, 32], strides = [1, 1]} : vector<8x128xf32> to vector<8x32xf32>
    %111 = arith.negf %110 : vector<8x32xf32>
    %112 = math.exp %111 : vector<8x32xf32>
    %cst_24 = arith.constant 1.000000e+00 : f32
    %113 = vector.broadcast %cst_24 : f32 to vector<8x32xf32>
    %114 = arith.addf %113, %112 : vector<8x32xf32>
    %115 = arith.divf %113, %114 : vector<8x32xf32>
    %116 = arith.mulf %107, %90 : vector<8x32xf32>
    %117 = arith.mulf %101, %109 : vector<8x32xf32>
    %118 = arith.addf %116, %117 : vector<8x32xf32>
    %119 = math.tanh %118 : vector<8x32xf32>
    %120 = arith.mulf %115, %119 : vector<8x32xf32>
    %121 = vector.extract_strided_slice %6 {offsets = [32, 0], sizes = [8, 128], strides = [1, 1]} : vector<64x128xf32> to vector<8x128xf32>
    %cst_25 = arith.constant dense<0.000000e+00> : vector<8x128xf32>
    %122 = tpu.matmul %120, %0, %cst_25 {dimension_numbers = #tpu.dot_dimension_numbers<[1], [0], [0], [1], [0, 0, 1, 1], [], []>} : vector<8x32xf32>, vector<32x128xf32>, vector<8x128xf32> -> vector<8x128xf32>
    %123 = arith.addf %121, %122 : vector<8x128xf32>
    %124 = vector.extract_strided_slice %123 {offsets = [0, 0], sizes = [8, 32], strides = [1, 1]} : vector<8x128xf32> to vector<8x32xf32>
    %125 = arith.negf %124 : vector<8x32xf32>
    %126 = math.exp %125 : vector<8x32xf32>
    %cst_26 = arith.constant 1.000000e+00 : f32
    %127 = vector.broadcast %cst_26 : f32 to vector<8x32xf32>
    %128 = arith.addf %127, %126 : vector<8x32xf32>
    %129 = arith.divf %127, %128 : vector<8x32xf32>
    %130 = vector.extract_strided_slice %123 {offsets = [0, 32], sizes = [8, 32], strides = [1, 1]} : vector<8x128xf32> to vector<8x32xf32>
    %131 = arith.negf %130 : vector<8x32xf32>
    %132 = math.exp %131 : vector<8x32xf32>
    %cst_27 = arith.constant 1.000000e+00 : f32
    %133 = vector.broadcast %cst_27 : f32 to vector<8x32xf32>
    %134 = arith.addf %133, %132 : vector<8x32xf32>
    %135 = arith.divf %133, %134 : vector<8x32xf32>
    %136 = vector.extract_strided_slice %123 {offsets = [0, 64], sizes = [8, 32], strides = [1, 1]} : vector<8x128xf32> to vector<8x32xf32>
    %137 = math.tanh %136 : vector<8x32xf32>
    %138 = vector.extract_strided_slice %123 {offsets = [0, 96], sizes = [8, 32], strides = [1, 1]} : vector<8x128xf32> to vector<8x32xf32>
    %139 = arith.negf %138 : vector<8x32xf32>
    %140 = math.exp %139 : vector<8x32xf32>
    %cst_28 = arith.constant 1.000000e+00 : f32
    %141 = vector.broadcast %cst_28 : f32 to vector<8x32xf32>
    %142 = arith.addf %141, %140 : vector<8x32xf32>
    %143 = arith.divf %141, %142 : vector<8x32xf32>
    %144 = arith.mulf %135, %118 : vector<8x32xf32>
    %145 = arith.mulf %129, %137 : vector<8x32xf32>
    %146 = arith.addf %144, %145 : vector<8x32xf32>
    %147 = math.tanh %146 : vector<8x32xf32>
    %148 = arith.mulf %143, %147 : vector<8x32xf32>
    %149 = vector.extract_strided_slice %6 {offsets = [40, 0], sizes = [8, 128], strides = [1, 1]} : vector<64x128xf32> to vector<8x128xf32>
    %cst_29 = arith.constant dense<0.000000e+00> : vector<8x128xf32>
    %150 = tpu.matmul %148, %0, %cst_29 {dimension_numbers = #tpu.dot_dimension_numbers<[1], [0], [0], [1], [0, 0, 1, 1], [], []>} : vector<8x32xf32>, vector<32x128xf32>, vector<8x128xf32> -> vector<8x128xf32>
    %151 = arith.addf %149, %150 : vector<8x128xf32>
    %152 = vector.extract_strided_slice %151 {offsets = [0, 0], sizes = [8, 32], strides = [1, 1]} : vector<8x128xf32> to vector<8x32xf32>
    %153 = arith.negf %152 : vector<8x32xf32>
    %154 = math.exp %153 : vector<8x32xf32>
    %cst_30 = arith.constant 1.000000e+00 : f32
    %155 = vector.broadcast %cst_30 : f32 to vector<8x32xf32>
    %156 = arith.addf %155, %154 : vector<8x32xf32>
    %157 = arith.divf %155, %156 : vector<8x32xf32>
    %158 = vector.extract_strided_slice %151 {offsets = [0, 32], sizes = [8, 32], strides = [1, 1]} : vector<8x128xf32> to vector<8x32xf32>
    %159 = arith.negf %158 : vector<8x32xf32>
    %160 = math.exp %159 : vector<8x32xf32>
    %cst_31 = arith.constant 1.000000e+00 : f32
    %161 = vector.broadcast %cst_31 : f32 to vector<8x32xf32>
    %162 = arith.addf %161, %160 : vector<8x32xf32>
    %163 = arith.divf %161, %162 : vector<8x32xf32>
    %164 = vector.extract_strided_slice %151 {offsets = [0, 64], sizes = [8, 32], strides = [1, 1]} : vector<8x128xf32> to vector<8x32xf32>
    %165 = math.tanh %164 : vector<8x32xf32>
    %166 = vector.extract_strided_slice %151 {offsets = [0, 96], sizes = [8, 32], strides = [1, 1]} : vector<8x128xf32> to vector<8x32xf32>
    %167 = arith.negf %166 : vector<8x32xf32>
    %168 = math.exp %167 : vector<8x32xf32>
    %cst_32 = arith.constant 1.000000e+00 : f32
    %169 = vector.broadcast %cst_32 : f32 to vector<8x32xf32>
    %170 = arith.addf %169, %168 : vector<8x32xf32>
    %171 = arith.divf %169, %170 : vector<8x32xf32>
    %172 = arith.mulf %163, %146 : vector<8x32xf32>
    %173 = arith.mulf %157, %165 : vector<8x32xf32>
    %174 = arith.addf %172, %173 : vector<8x32xf32>
    %175 = math.tanh %174 : vector<8x32xf32>
    %176 = arith.mulf %171, %175 : vector<8x32xf32>
    %177 = vector.extract_strided_slice %6 {offsets = [48, 0], sizes = [8, 128], strides = [1, 1]} : vector<64x128xf32> to vector<8x128xf32>
    %cst_33 = arith.constant dense<0.000000e+00> : vector<8x128xf32>
    %178 = tpu.matmul %176, %0, %cst_33 {dimension_numbers = #tpu.dot_dimension_numbers<[1], [0], [0], [1], [0, 0, 1, 1], [], []>} : vector<8x32xf32>, vector<32x128xf32>, vector<8x128xf32> -> vector<8x128xf32>
    %179 = arith.addf %177, %178 : vector<8x128xf32>
    %180 = vector.extract_strided_slice %179 {offsets = [0, 0], sizes = [8, 32], strides = [1, 1]} : vector<8x128xf32> to vector<8x32xf32>
    %181 = arith.negf %180 : vector<8x32xf32>
    %182 = math.exp %181 : vector<8x32xf32>
    %cst_34 = arith.constant 1.000000e+00 : f32
    %183 = vector.broadcast %cst_34 : f32 to vector<8x32xf32>
    %184 = arith.addf %183, %182 : vector<8x32xf32>
    %185 = arith.divf %183, %184 : vector<8x32xf32>
    %186 = vector.extract_strided_slice %179 {offsets = [0, 32], sizes = [8, 32], strides = [1, 1]} : vector<8x128xf32> to vector<8x32xf32>
    %187 = arith.negf %186 : vector<8x32xf32>
    %188 = math.exp %187 : vector<8x32xf32>
    %cst_35 = arith.constant 1.000000e+00 : f32
    %189 = vector.broadcast %cst_35 : f32 to vector<8x32xf32>
    %190 = arith.addf %189, %188 : vector<8x32xf32>
    %191 = arith.divf %189, %190 : vector<8x32xf32>
    %192 = vector.extract_strided_slice %179 {offsets = [0, 64], sizes = [8, 32], strides = [1, 1]} : vector<8x128xf32> to vector<8x32xf32>
    %193 = math.tanh %192 : vector<8x32xf32>
    %194 = vector.extract_strided_slice %179 {offsets = [0, 96], sizes = [8, 32], strides = [1, 1]} : vector<8x128xf32> to vector<8x32xf32>
    %195 = arith.negf %194 : vector<8x32xf32>
    %196 = math.exp %195 : vector<8x32xf32>
    %cst_36 = arith.constant 1.000000e+00 : f32
    %197 = vector.broadcast %cst_36 : f32 to vector<8x32xf32>
    %198 = arith.addf %197, %196 : vector<8x32xf32>
    %199 = arith.divf %197, %198 : vector<8x32xf32>
    %200 = arith.mulf %191, %174 : vector<8x32xf32>
    %201 = arith.mulf %185, %193 : vector<8x32xf32>
    %202 = arith.addf %200, %201 : vector<8x32xf32>
    %203 = math.tanh %202 : vector<8x32xf32>
    %204 = arith.mulf %199, %203 : vector<8x32xf32>
    %205 = vector.extract_strided_slice %6 {offsets = [56, 0], sizes = [8, 128], strides = [1, 1]} : vector<64x128xf32> to vector<8x128xf32>
    %cst_37 = arith.constant dense<0.000000e+00> : vector<8x128xf32>
    %206 = tpu.matmul %204, %0, %cst_37 {dimension_numbers = #tpu.dot_dimension_numbers<[1], [0], [0], [1], [0, 0, 1, 1], [], []>} : vector<8x32xf32>, vector<32x128xf32>, vector<8x128xf32> -> vector<8x128xf32>
    %207 = arith.addf %205, %206 : vector<8x128xf32>
    %208 = vector.extract_strided_slice %207 {offsets = [0, 0], sizes = [8, 32], strides = [1, 1]} : vector<8x128xf32> to vector<8x32xf32>
    %209 = arith.negf %208 : vector<8x32xf32>
    %210 = math.exp %209 : vector<8x32xf32>
    %cst_38 = arith.constant 1.000000e+00 : f32
    %211 = vector.broadcast %cst_38 : f32 to vector<8x32xf32>
    %212 = arith.addf %211, %210 : vector<8x32xf32>
    %213 = arith.divf %211, %212 : vector<8x32xf32>
    %214 = vector.extract_strided_slice %207 {offsets = [0, 32], sizes = [8, 32], strides = [1, 1]} : vector<8x128xf32> to vector<8x32xf32>
    %215 = arith.negf %214 : vector<8x32xf32>
    %216 = math.exp %215 : vector<8x32xf32>
    %cst_39 = arith.constant 1.000000e+00 : f32
    %217 = vector.broadcast %cst_39 : f32 to vector<8x32xf32>
    %218 = arith.addf %217, %216 : vector<8x32xf32>
    %219 = arith.divf %217, %218 : vector<8x32xf32>
    %220 = vector.extract_strided_slice %207 {offsets = [0, 64], sizes = [8, 32], strides = [1, 1]} : vector<8x128xf32> to vector<8x32xf32>
    %221 = math.tanh %220 : vector<8x32xf32>
    %222 = vector.extract_strided_slice %207 {offsets = [0, 96], sizes = [8, 32], strides = [1, 1]} : vector<8x128xf32> to vector<8x32xf32>
    %223 = arith.negf %222 : vector<8x32xf32>
    %224 = math.exp %223 : vector<8x32xf32>
    %cst_40 = arith.constant 1.000000e+00 : f32
    %225 = vector.broadcast %cst_40 : f32 to vector<8x32xf32>
    %226 = arith.addf %225, %224 : vector<8x32xf32>
    %227 = arith.divf %225, %226 : vector<8x32xf32>
    %228 = arith.mulf %219, %202 : vector<8x32xf32>
    %229 = arith.mulf %213, %221 : vector<8x32xf32>
    %230 = arith.addf %228, %229 : vector<8x32xf32>
    %231 = math.tanh %230 : vector<8x32xf32>
    %232 = arith.mulf %227, %231 : vector<8x32xf32>
    %c0_41 = arith.constant 0 : index
    %c0_42 = arith.constant 0 : index
    %233 = vector.load %arg7[%c0_41, %c0_42] : memref<8x32xf32, #tpu.memory_space<vmem>>, vector<8x32xf32>
    tpu.vector_store %arg7[%c0_41, %c0_42], %232 {strides = array<i32>} : memref<8x32xf32, #tpu.memory_space<vmem>>, vector<8x32xf32>,
    %c0_43 = arith.constant 0 : index
    %c0_44 = arith.constant 0 : index
    %234 = vector.load %arg4[%c0_43, %c0_44] : memref<32x128xf32, #tpu.memory_space<vmem>>, vector<32x128xf32>
    %cst_45 = arith.constant dense<0.000000e+00> : vector<8x128xf32>
    %235 = tpu.matmul %232, %234, %cst_45 {dimension_numbers = #tpu.dot_dimension_numbers<[1], [0], [0], [1], [0, 0, 1, 1], [], []>} : vector<8x32xf32>, vector<32x128xf32>, vector<8x128xf32> -> vector<8x128xf32>
    %c0_46 = arith.constant 0 : index
    %c0_47 = arith.constant 0 : index
    %236 = vector.load %arg5[%c0_46, %c0_47] : memref<1x128xf32, #tpu.memory_space<vmem>>, vector<1x128xf32>
    %237 = vector.broadcast %236 : vector<1x128xf32> to vector<8x128xf32>
    %238 = arith.addf %235, %237 : vector<8x128xf32>
    %c0_48 = arith.constant 0 : index
    %c0_49 = arith.constant 0 : index
    %239 = vector.load %arg6[%c0_48, %c0_49] : memref<8x128xf32, #tpu.memory_space<vmem>>, vector<8x128xf32>
    tpu.vector_store %arg6[%c0_48, %c0_49], %238 {strides = array<i32>} : memref<8x128xf32, #tpu.memory_space<vmem>>, vector<8x128xf32>,
    return
  }
}

</mosaic_0001>

<bundles_post_ra>
// kernel: tpu_custom_call.1
= control target key start
LH: loop header
LB: loop body
LE: loop exit
PB: predicated region body
PF: predicated region fallthrough
CT: control target
= control target key end

     0   :  { %13 = vsyncpa [#allocation3], 0  ;;  %vm45_vm0 = vcmask 130048   ;;  %s1052_s0 = inlined_call_operand.vmem [shape: f32[64,16], index: 0, kind: input, shape index: {}]   ;;  %s1053_s1 = inlined_call_operand.vmem [shape: f32[16,128], index: 1, kind: input, shape index: {}]   ;;  %s1054_s2 = inlined_call_operand.vmem [shape: f32[32,128], index: 2, kind: input, shape index: {}]   ;;  %s1055_s3 = inlined_call_operand.vmem [shape: f32[1,128], index: 3, kind: input, shape index: {}]   ;;  %s1056_s4 = inlined_call_operand.vmem [shape: f32[32,128], index: 4, kind: input, shape index: {}]   ;;  %s1057_s5 = inlined_call_operand.vmem [shape: f32[1,128], index: 5, kind: input, shape index: {}]   ;;  %s1058_s6 = inlined_call_operand.hbm [shape: f32[8,128], index: 6, kind: output, shape index: {0}]   ;;  %s1059_s7 = inlined_call_operand.hbm [shape: f32[8,32], index: 7, kind: output, shape index: {1}]  }
   0x1   :  { %v40_v0 = vld [vmem:[%s1053_s1 + $0x8] sm:$0xff]  ;;  %v39_v1 = vld [vmem:[%s1053_s1] sm:$0xff]  ;;  %v890_v3 = vld [vmem:[%s1054_s2 + $0x18] sm:$0xff] }
   0x2   :  { %706 = vmatpush.msra.mxu1 %v40_v0  ;;  %v36_v2 = vld [vmem:[%s1052_s0 + $0x28] sm:$0xff]  ;;  %84 = vmatpush.msra.mxu0 %v40_v0  ;;  %v31_v4 = vld [vmem:[%s1052_s0] sm:$0xff] }
   0x3   :  { %707 = vmatpush.msra.mxu2 %v40_v0  ;;  %253 = vmatpush.msra.mxu3 %v890_v3 }
   0x4   :  { %708 = vmatpush.msra.mxu1 %v39_v1  ;;  %85 = vmatpush.msra.mxu0 %v39_v1 }
   0x5   :  { %14 = vsyncpa [#allocation5], 0  ;;  %687 = vmatmul.msk.f32.vlgmr.msra.gmra.mxu1 %vm45_vm0, %v36_v2  ;;  %v900_v5 = vld [vmem:[%s1054_s2 + $0x10] sm:$0xff]  ;;  %682 = vmatmul.msk.f32.vlgmr.msra.gmra.mxu0 %vm45_vm0, %v31_v4  ;;  %v907_v6 = vld [vmem:[%s1054_s2 + $0x8] sm:$0xff]  ;;  %v833_v8 = vmov 0.0   ;;  %s834_s17 = smov 64  }
   0x6   :  { %127 = vmatpush.msrb.mxu1 %v890_v3  ;;  %709 = vmatpush.msra.mxu2 %v39_v1  ;;  %v915_v7 = vld [vmem:[%s1054_s2] sm:$0xff]  ;;  %v37_v35 = vld [vmem:[%s1052_s0 + $0x30] sm:$0xff]  ;;  %v38_v36 = vld [vmem:[%s1052_s0 + $0x38] sm:$0xff]  ;;  %vm111_vm5 = vcmask 261120   ;;  %s836_s13 = smov [#allocation4]   ;;  %s668_s16 = sshll.u32 %s1059_s7, 4  ;;  %s669_s16 = int_to_ptr.hbm [resolvable:$true] %s668_s16 }
   0x7   :  { %254 = vmatpush.msra.mxu3 %v900_v5  ;;  %v941_v11 = vld [vmem:[%s1055_s3] ss:$0 sm:$0xff]  ;;  %s835_s3 = smov 32   ;;  %688 = vmatmul.msk.f32.vlgmr.msra.gmra.mxu2 %vm45_vm0, %v37_v35  ;;  %v32_v39 = vld [vmem:[%s1052_s0 + $0x8] sm:$0xff]  ;;  %s666_s14 = sshll.u32 %s836_s13, 4  ;;  %s667_s14 = int_to_ptr.vmem [resolvable:$true] %s666_s14 }
   0x8   :  { %190 = vmatpush.msrb.mxu2 %v890_v3  ;;  %128 = vmatpush.msrb.mxu1 %v900_v5  ;;  %s837_s18 = smov [#allocation2]   ;;  %s657_s21 = sshll.u32 %s1058_s6, 4  ;;  %s658_s21 = int_to_ptr.hbm [resolvable:$true] %s657_s21 }
   0x9   :  { %255 = vmatpush.msra.mxu3 %v907_v6 }
   0xa   :  { %191 = vmatpush.msrb.mxu2 %v900_v5  ;;  %129 = vmatpush.msrb.mxu1 %v907_v6 }
   0xb   :  { %256 = vmatpush.msra.mxu3 %v915_v7 }
   0xc   :  { %192 = vmatpush.msrb.mxu2 %v907_v6  ;;  %130 = vmatpush.msrb.mxu1 %v915_v7 }
   0xd   :  { %442 = vmatpush.msrb.mxu3 %v890_v3  ;;  %131 = vmatmul.f32.vlgmr.msrb.gmra.mxu1 %v833_v8 }
   0xe   :  { %193 = vmatpush.msrb.mxu2 %v915_v7  ;;  %316 = vmatpush.msra.mxu1 %v890_v3 }
   0xf   :  { %443 = vmatpush.msrb.mxu3 %v900_v5  ;;  %689 = vmatmul.msk.f32.gmra.mxu2 %vm45_vm0, %v38_v36 }
  0x10   :  { %317 = vmatpush.msra.mxu1 %v900_v5  ;;  %379 = vmatpush.msra.mxu2 %v890_v3 }
  0x11   :  { %444 = vmatpush.msrb.mxu3 %v907_v6  ;;  %683 = vmatmul.msk.f32.gmra.mxu0 %vm45_vm0, %v32_v39 }
  0x12   :  { %318 = vmatpush.msra.mxu1 %v907_v6  ;;  %380 = vmatpush.msra.mxu2 %v900_v5 }
  0x13   :  { %445 = vmatpush.msrb.mxu3 %v915_v7 }
  0x14   :  { %319 = vmatpush.msra.mxu1 %v915_v7  ;;  %381 = vmatpush.msra.mxu2 %v907_v6 }
  0x16   :  { %505 = vmatpush.msrb.mxu1 %v890_v3  ;;  %382 = vmatpush.msra.mxu2 %v915_v7 }
  0x18   :  { %506 = vmatpush.msrb.mxu1 %v900_v5 }
  0x1a   :  { %507 = vmatpush.msrb.mxu1 %v907_v6 }
  0x1c   :  { %508 = vmatpush.msrb.mxu1 %v915_v7 }
  0x82   :  { %v936_v9 = vpop.f32.mrf.mxu1  ;;  %v87_v10 = vpop.f32.mrf.mxu0 }
  0x83   :  { %v88_v12 = vadd.f32 %v941_v11, %v87_v10 }
  0x8a   :  { %v132_v13 = vpop.f32.mrf.mxu1  ;;  %v969_v41 = vpop.f32.mrf.mxu2 }
  0x8b   :  { %v135_v14 = vadd.f32 %v132_v13, %v88_v12 }
  0x8d   :  { %717 = vtanh.f32 %v135_v14  ;;  %v690_v16 = vmul.f32 -1.442695, %v135_v14 }
  0x8e   :  { %v90_v43 = vpop.f32.mrf.mxu0 }
  0x8f   :  { %719 = vpow2.f32 %v690_v16  ;;  %v91_v44 = vadd.f32 %v941_v11, %v90_v43 }
  0x92   :  { %v971_v42 = vpop.f32.mrf.mxu2 }
  0x93   :  { %v718_v15 = vpop.eup %717 }
  0x94   :  { %158 = vrot.lane.b32.xlu0 %v718_v15, %s834_s17 }
  0x95   :  { %v720_v17 = vpop.eup %719 }
  0x96   :  { %v139_v18 = vadd.f32 1.0, %v720_v17 }
  0x98   :  { %721 = vrcp.f32 %v139_v18  ;;  %v151_v24 = vand.u32 2147483648, %v139_v18  ;;  %vm145_vm2 = vweird.f32 %v139_v18  ;;  %v149_v25 = vand.u32 2147483647, %v139_v18 }
  0x9a   :  { %v152_v27 = vor.u32 1.1754944e-38, %v151_v24  ;;  %vm150_vm4 = vcmp.eq.f32.partialorder %v149_v25, 8.507059e+37 }
  0x9e   :  { %v722_v19 = vpop.eup %721 }
  0x9f   :  { %v141_v20 = vmul.f32 %v722_v19, %v139_v18  ;;  %vm146_vm1 = vweird.f32 %v722_v19 }
  0xa0   :  { %vm147_vm3 = vmor %vm145_vm2, %vm146_vm1 }
  0xa1   :  { %v142_v21 = vsub.f32 1.0, %v141_v20 }
  0xa3   :  { %v143_v22 = vmul.f32 %v722_v19, %v142_v21 }
  0xa5   :  { %v144_v23 = vadd.f32 %v722_v19, %v143_v22 }
  0xa7   :  { %v148_v26 = vsel %vm147_vm3, %v722_v19, %v144_v23 }
  0xa8   :  { %v153_v29 = vsel %vm150_vm4, %v152_v27, %v148_v26 }
  0xa9   :  { %v156_v31 = vmul.f32 0.0, %v153_v29 }
 0x106   :  { %v159_v28 = vpop.permute.xlu0 %158 }
 0x107   :  { %v161_v30 = vmul.f32 %v159_v28, %v153_v29 }
 0x109   :  { %163 = vrot.lane.b32.xlu0 %v161_v30, %s835_s3 }
 0x17b   :  { %v164_v32 = vpop.permute.xlu0 %163 }
 0x17c   :  { %v166_v33 = vadd.f32 %v164_v32, %v156_v31 }
 0x17e   :  { %723 = vtanh.f32 %v166_v33 }
 0x184   :  { %v724_v34 = vpop.eup %723 }
 0x185   :  { %169 = vrot.lane.b32.xlu1 %v724_v34, %s834_s17 }
 0x1f7   :  { %v170_v37 = vpop.permute.xlu1 %169 }
 0x1f8   :  { %v172_v38 = vmul.f32 %v170_v37, %v153_v29 }
 0x1fa   :  { %174 = vrot.lane.b32.xlu1 %v172_v38, %s835_s3 }
 0x26c   :  { %v175_v40 = vpop.permute.xlu1 %174 }
 0x26d   :  { %691 = vmatmul.msk.f32.vlgmr.msrb.gmra.mxu2 %vm111_vm5, %v175_v40 }
 0x26e   :  { %568 = vmatpush.msrb.mxu2 %v890_v3 }
 0x270   :  { %569 = vmatpush.msrb.mxu2 %v900_v5  ;;  %v33_v5 = vld [vmem:[%s1052_s0 + $0x10] sm:$0xff] }
 0x271   :  { %684 = vmatmul.msk.f32.gmra.mxu0 %vm45_vm0, %v33_v5 }
 0x272   :  { %570 = vmatpush.msrb.mxu2 %v907_v6 }
 0x274   :  { %571 = vmatpush.msrb.mxu2 %v915_v7 }
 0x2ee   :  { %v93_v7 = vpop.f32.mrf.mxu0 }
 0x2ef   :  { %v94_v8 = vadd.f32 %v941_v11, %v93_v7 }
 0x2f0   :  { %v195_v45 = vpop.f32.mrf.mxu2 }
 0x2f1   :  { %v198_v46 = vadd.f32 %v195_v45, %v91_v44 }
 0x2f3   :  { %725 = vtanh.f32 %v198_v46  ;;  %v692_v48 = vmul.f32 -1.442695, %v198_v46 }
 0x2f5   :  { %727 = vpow2.f32 %v692_v48 }
 0x2f9   :  { %v726_v47 = vpop.eup %725 }
 0x2fa   :  { %221 = vrot.lane.b32.xlu2 %v726_v47, %s834_s17 }
 0x2fb   :  { %v728_v49 = vpop.eup %727 }
 0x2fc   :  { %v202_v50 = vadd.f32 1.0, %v728_v49 }
 0x2fe   :  { %729 = vrcp.f32 %v202_v50  ;;  %v214_v56 = vand.u32 2147483648, %v202_v50  ;;  %vm208_vm7 = vweird.f32 %v202_v50  ;;  %v212_v57 = vand.u32 2147483647, %v202_v50 }
 0x300   :  { %v215_v59 = vor.u32 1.1754944e-38, %v214_v56  ;;  %vm213_vm9 = vcmp.eq.f32.partialorder %v212_v57, 8.507059e+37 }
 0x304   :  { %v730_v51 = vpop.eup %729 }
 0x305   :  { %v204_v52 = vmul.f32 %v730_v51, %v202_v50  ;;  %vm209_vm6 = vweird.f32 %v730_v51 }
 0x306   :  { %vm210_vm8 = vmor %vm208_vm7, %vm209_vm6 }
 0x307   :  { %v205_v53 = vsub.f32 1.0, %v204_v52 }
 0x309   :  { %v206_v54 = vmul.f32 %v730_v51, %v205_v53 }
 0x30b   :  { %v207_v55 = vadd.f32 %v730_v51, %v206_v54 }
 0x30d   :  { %v211_v58 = vsel %vm210_vm8, %v730_v51, %v207_v55 }
 0x30e   :  { %v216_v61 = vsel %vm213_vm9, %v215_v59, %v211_v58 }
 0x30f   :  { %v219_v63 = vmul.f32 %v216_v61, %v166_v33  ;;  %v34_v33 = vld [vmem:[%s1052_s0 + $0x18] sm:$0xff] }
 0x310   :  { %685 = vmatmul.msk.f32.gmra.mxu0 %vm45_vm0, %v34_v33 }
 0x354   :  { %v222_v60 = vpop.permute.xlu2 %221 }
 0x355   :  { %v224_v62 = vmul.f32 %v222_v60, %v216_v61 }
 0x357   :  { %226 = vrot.lane.b32.xlu2 %v224_v62, %s835_s3 }
 0x38d   :  { %v96_v37 = vpop.f32.mrf.mxu0 }
 0x38e   :  { %v97_v38 = vadd.f32 %v941_v11, %v96_v37 }
 0x3b1   :  { %v227_v0 = vpop.permute.xlu2 %226 }
 0x3b2   :  { %v229_v1 = vadd.f32 %v227_v0, %v219_v63 }
 0x3b4   :  { %731 = vtanh.f32 %v229_v1 }
 0x3ba   :  { %v732_v2 = vpop.eup %731 }
 0x3bb   :  { %232 = vrot.lane.b32.xlu0 %v732_v2, %s834_s17 }
 0x42d   :  { %v233_v3 = vpop.permute.xlu0 %232 }
 0x42e   :  { %v235_v4 = vmul.f32 %v233_v3, %v216_v61 }
 0x430   :  { %237 = vrot.lane.b32.xlu1 %v235_v4, %s835_s3 }
 0x4a2   :  { %v238_v6 = vpop.permute.xlu1 %237 }
 0x4a3   :  { %693 = vmatmul.msk.f32.vlgmr.msra.gmra.mxu3 %vm111_vm5, %v238_v6 }
 0x526   :  { %v258_v10 = vpop.f32.mrf.mxu3 }
 0x527   :  { %v261_v12 = vadd.f32 %v258_v10, %v94_v8 }
 0x529   :  { %733 = vtanh.f32 %v261_v12  ;;  %v694_v14 = vmul.f32 -1.442695, %v261_v12 }
 0x52b   :  { %735 = vpow2.f32 %v694_v14 }
 0x52f   :  { %v734_v13 = vpop.eup %733 }
 0x530   :  { %284 = vrot.lane.b32.xlu2 %v734_v13, %s834_s17 }
 0x531   :  { %v736_v15 = vpop.eup %735 }
 0x532   :  { %v265_v16 = vadd.f32 1.0, %v736_v15 }
 0x534   :  { %737 = vrcp.f32 %v265_v16  ;;  %v277_v22 = vand.u32 2147483648, %v265_v16  ;;  %vm271_vm11 = vweird.f32 %v265_v16  ;;  %v275_v23 = vand.u32 2147483647, %v265_v16 }
 0x536   :  { %v278_v25 = vor.u32 1.1754944e-38, %v277_v22  ;;  %vm276_vm13 = vcmp.eq.f32.partialorder %v275_v23, 8.507059e+37 }
 0x53a   :  { %v738_v17 = vpop.eup %737 }
 0x53b   :  { %v267_v18 = vmul.f32 %v738_v17, %v265_v16  ;;  %vm272_vm10 = vweird.f32 %v738_v17 }
 0x53c   :  { %vm273_vm12 = vmor %vm271_vm11, %vm272_vm10 }
 0x53d   :  { %v268_v19 = vsub.f32 1.0, %v267_v18 }
 0x53f   :  { %v269_v20 = vmul.f32 %v738_v17, %v268_v19 }
 0x541   :  { %v270_v21 = vadd.f32 %v738_v17, %v269_v20 }
 0x543   :  { %v274_v24 = vsel %vm273_vm12, %v738_v17, %v270_v21 }
 0x544   :  { %v279_v27 = vsel %vm276_vm13, %v278_v25, %v274_v24 }
 0x545   :  { %v282_v29 = vmul.f32 %v279_v27, %v229_v1  ;;  %v35_v1 = vld [vmem:[%s1052_s0 + $0x20] sm:$0xff] }
 0x546   :  { %686 = vmatmul.msk.f32.gmra.mxu0 %vm45_vm0, %v35_v1 }
 0x58a   :  { %v285_v26 = vpop.permute.xlu2 %284 }
 0x58b   :  { %v287_v28 = vmul.f32 %v285_v26, %v279_v27 }
 0x58d   :  { %289 = vrot.lane.b32.xlu0 %v287_v28, %s835_s3 }
 0x5c3   :  { %v99_v3 = vpop.f32.mrf.mxu0 }
 0x5c4   :  { %v100_v4 = vadd.f32 %v941_v11, %v99_v3 }
 0x5ff   :  { %v290_v30 = vpop.permute.xlu0 %289 }
 0x600   :  { %v292_v31 = vadd.f32 %v290_v30, %v282_v29 }
 0x602   :  { %739 = vtanh.f32 %v292_v31 }
 0x608   :  { %v740_v32 = vpop.eup %739 }
 0x609   :  { %295 = vrot.lane.b32.xlu1 %v740_v32, %s834_s17  ;;  %v103_v32 = vadd.f32 %v941_v11, %v936_v9 }
 0x67b   :  { %v296_v34 = vpop.permute.xlu1 %295 }
 0x67c   :  { %v298_v35 = vmul.f32 %v296_v34, %v279_v27 }
 0x67e   :  { %300 = vrot.lane.b32.xlu2 %v298_v35, %s835_s3 }
 0x6d8   :  { %v301_v36 = vpop.permute.xlu2 %300 }
 0x6d9   :  { %695 = vmatmul.msk.f32.vlgmr.msra.gmra.mxu1 %vm111_vm5, %v301_v36 }
 0x756   :  { %v321_v39 = vpop.f32.mrf.mxu1 }
 0x757   :  { %v324_v40 = vadd.f32 %v321_v39, %v97_v38 }
 0x759   :  { %741 = vtanh.f32 %v324_v40  ;;  %v696_v44 = vmul.f32 -1.442695, %v324_v40 }
 0x75b   :  { %743 = vpow2.f32 %v696_v44 }
 0x75f   :  { %v742_v43 = vpop.eup %741 }
 0x760   :  { %347 = vrot.lane.b32.xlu0 %v742_v43, %s834_s17 }
 0x761   :  { %v744_v45 = vpop.eup %743 }
 0x762   :  { %v328_v46 = vadd.f32 1.0, %v744_v45 }
 0x764   :  { %745 = vrcp.f32 %v328_v46  ;;  %v340_v52 = vand.u32 2147483648, %v328_v46  ;;  %vm334_vm15 = vweird.f32 %v328_v46  ;;  %v338_v53 = vand.u32 2147483647, %v328_v46 }
 0x766   :  { %v341_v55 = vor.u32 1.1754944e-38, %v340_v52  ;;  %vm339_vm2 = vcmp.eq.f32.partialorder %v338_v53, 8.507059e+37 }
 0x76a   :  { %v746_v47 = vpop.eup %745 }
 0x76b   :  { %v330_v48 = vmul.f32 %v746_v47, %v328_v46  ;;  %vm335_vm14 = vweird.f32 %v746_v47 }
 0x76c   :  { %vm336_vm1 = vmor %vm334_vm15, %vm335_vm14 }
 0x76d   :  { %v331_v49 = vsub.f32 1.0, %v330_v48 }
 0x76f   :  { %v332_v50 = vmul.f32 %v746_v47, %v331_v49 }
 0x771   :  { %v333_v51 = vadd.f32 %v746_v47, %v332_v50 }
 0x773   :  { %v337_v54 = vsel %vm336_vm1, %v746_v47, %v333_v51 }
 0x774   :  { %v342_v57 = vsel %vm339_vm2, %v341_v55, %v337_v54 }
 0x775   :  { %v345_v59 = vmul.f32 %v342_v57, %v292_v31 }
 0x7d2   :  { %v348_v56 = vpop.permute.xlu0 %347 }
 0x7d3   :  { %v350_v58 = vmul.f32 %v348_v56, %v342_v57 }
 0x7d5   :  { %352 = vrot.lane.b32.xlu1 %v350_v58, %s835_s3 }
 0x847   :  { %v353_v60 = vpop.permute.xlu1 %352 }
 0x848   :  { %v355_v61 = vadd.f32 %v353_v60, %v345_v59  ;;  %v106_v59 = vadd.f32 %v941_v11, %v969_v41 }
 0x84a   :  { %747 = vtanh.f32 %v355_v61 }
 0x850   :  { %v748_v62 = vpop.eup %747 }
 0x851   :  { %358 = vrot.lane.b32.xlu2 %v748_v62, %s834_s17 }
 0x8ab   :  { %v359_v63 = vpop.permute.xlu2 %358 }
 0x8ac   :  { %v361_v0 = vmul.f32 %v359_v63, %v342_v57 }
 0x8ae   :  { %363 = vrot.lane.b32.xlu0 %v361_v0, %s835_s3 }
 0x920   :  { %v364_v2 = vpop.permute.xlu0 %363 }
 0x921   :  { %697 = vmatmul.msk.f32.vlgmr.msra.gmra.mxu2 %vm111_vm5, %v364_v2 }
 0x9a4   :  { %v384_v5 = vpop.f32.mrf.mxu2 }
 0x9a5   :  { %v387_v6 = vadd.f32 %v384_v5, %v100_v4 }
 0x9a7   :  { %749 = vtanh.f32 %v387_v6  ;;  %v698_v8 = vmul.f32 -1.442695, %v387_v6 }
 0x9a9   :  { %751 = vpow2.f32 %v698_v8 }
 0x9ad   :  { %v750_v7 = vpop.eup %749 }
 0x9ae   :  { %410 = vrot.lane.b32.xlu1 %v750_v7, %s834_s17 }
 0x9af   :  { %v752_v10 = vpop.eup %751 }
 0x9b0   :  { %v391_v12 = vadd.f32 1.0, %v752_v10 }
 0x9b2   :  { %753 = vrcp.f32 %v391_v12  ;;  %v403_v18 = vand.u32 2147483648, %v391_v12  ;;  %vm397_vm3 = vweird.f32 %v391_v12  ;;  %v401_v19 = vand.u32 2147483647, %v391_v12 }
 0x9b4   :  { %v404_v21 = vor.u32 1.1754944e-38, %v403_v18  ;;  %vm402_vm6 = vcmp.eq.f32.partialorder %v401_v19, 8.507059e+37 }
 0x9b8   :  { %v754_v13 = vpop.eup %753 }
 0x9b9   :  { %v393_v14 = vmul.f32 %v754_v13, %v391_v12  ;;  %vm398_vm0 = vweird.f32 %v754_v13 }
 0x9ba   :  { %vm399_vm4 = vmor %vm397_vm3, %vm398_vm0 }
 0x9bb   :  { %v394_v15 = vsub.f32 1.0, %v393_v14 }
 0x9bd   :  { %v395_v16 = vmul.f32 %v754_v13, %v394_v15 }
 0x9bf   :  { %v396_v17 = vadd.f32 %v754_v13, %v395_v16 }
 0x9c1   :  { %v400_v20 = vsel %vm399_vm4, %v754_v13, %v396_v17 }
 0x9c2   :  { %v405_v23 = vsel %vm402_vm6, %v404_v21, %v400_v20 }
 0x9c3   :  { %v408_v25 = vmul.f32 %v405_v23, %v355_v61 }
 0xa20   :  { %v411_v22 = vpop.permute.xlu1 %410 }
 0xa21   :  { %v413_v24 = vmul.f32 %v411_v22, %v405_v23  ;;  %v109_v22 = vadd.f32 %v941_v11, %v971_v42 }
 0xa23   :  { %415 = vrot.lane.b32.xlu2 %v413_v24, %s835_s3 }
 0xa7d   :  { %v416_v26 = vpop.permute.xlu2 %415 }
 0xa7e   :  { %v418_v27 = vadd.f32 %v416_v26, %v408_v25 }
 0xa80   :  { %755 = vtanh.f32 %v418_v27 }
 0xa86   :  { %v756_v28 = vpop.eup %755 }
 0xa87   :  { %421 = vrot.lane.b32.xlu0 %v756_v28, %s834_s17 }
 0xaf9   :  { %v422_v29 = vpop.permute.xlu0 %421 }
 0xafa   :  { %v424_v30 = vmul.f32 %v422_v29, %v405_v23 }
 0xafc   :  { %426 = vrot.lane.b32.xlu1 %v424_v30, %s835_s3 }
 0xb6e   :  { %v427_v31 = vpop.permute.xlu1 %426 }
 0xb6f   :  { %699 = vmatmul.msk.f32.vlgmr.msrb.gmra.mxu3 %vm111_vm5, %v427_v31 }
 0xbf2   :  { %v447_v33 = vpop.f32.mrf.mxu3 }
 0xbf3   :  { %v450_v34 = vadd.f32 %v447_v33, %v103_v32 }
 0xbf5   :  { %757 = vtanh.f32 %v450_v34  ;;  %v700_v36 = vmul.f32 -1.442695, %v450_v34 }
 0xbf7   :  { %759 = vpow2.f32 %v700_v36 }
 0xbfb   :  { %v758_v35 = vpop.eup %757 }
 0xbfc   :  { %473 = vrot.lane.b32.xlu2 %v758_v35, %s834_s17 }
 0xbfd   :  { %v760_v37 = vpop.eup %759 }
 0xbfe   :  { %v454_v38 = vadd.f32 1.0, %v760_v37 }
 0xc00   :  { %761 = vrcp.f32 %v454_v38  ;;  %v466_v46 = vand.u32 2147483648, %v454_v38  ;;  %vm460_vm8 = vweird.f32 %v454_v38  ;;  %v464_v9 = vand.u32 2147483647, %v454_v38 }
 0xc02   :  { %v467_v48 = vor.u32 1.1754944e-38, %v466_v46  ;;  %vm465_vm10 = vcmp.eq.f32.partialorder %v464_v9, 8.507059e+37  ;;  %v621_v46 = vld [vmem:[%s1056_s4 + $0x10] sm:$0xff]  ;;  %v620_v9 = vld [vmem:[%s1056_s4 + $0x8] sm:$0xff] }
 0xc06   :  { %v762_v39 = vpop.eup %761 }
 0xc07   :  { %v456_v40 = vmul.f32 %v762_v39, %v454_v38  ;;  %vm461_vm7 = vweird.f32 %v762_v39 }
 0xc08   :  { %vm462_vm9 = vmor %vm460_vm8, %vm461_vm7 }
 0xc09   :  { %v457_v43 = vsub.f32 1.0, %v456_v40 }
 0xc0b   :  { %v458_v44 = vmul.f32 %v762_v39, %v457_v43 }
 0xc0d   :  { %v459_v45 = vadd.f32 %v762_v39, %v458_v44 }
 0xc0f   :  { %v463_v47 = vsel %vm462_vm9, %v762_v39, %v459_v45  ;;  %v622_v45 = vld [vmem:[%s1056_s4 + $0x18] sm:$0xff] }
 0xc10   :  { %v468_v50 = vsel %vm465_vm10, %v467_v48, %v463_v47  ;;  %641 = vmatpush.msra.mxu3 %v622_v45  ;;  %v619_v47 = vld [vmem:[%s1056_s4] sm:$0xff] }
 0xc11   :  { %v471_v52 = vmul.f32 %v468_v50, %v418_v27 }
 0xc12   :  { %642 = vmatpush.msra.mxu3 %v621_v46 }
 0xc14   :  { %643 = vmatpush.msra.mxu3 %v620_v9 }
 0xc16   :  { %644 = vmatpush.msra.mxu3 %v619_v47 }
 0xc56   :  { %v474_v49 = vpop.permute.xlu2 %473 }
 0xc57   :  { %v476_v51 = vmul.f32 %v474_v49, %v468_v50 }
 0xc59   :  { %478 = vrot.lane.b32.xlu0 %v476_v51, %s835_s3  ;;  %v716_v51 = vld [vmem:[%s1057_s5] ss:$0 sm:$0xff] }
 0xccb   :  { %v479_v53 = vpop.permute.xlu0 %478 }
 0xccc   :  { %v481_v54 = vadd.f32 %v479_v53, %v471_v52 }
 0xcce   :  { %763 = vtanh.f32 %v481_v54 }
 0xcd4   :  { %v764_v55 = vpop.eup %763 }
 0xcd5   :  { %484 = vrot.lane.b32.xlu1 %v764_v55, %s834_s17 }
 0xd47   :  { %v485_v56 = vpop.permute.xlu1 %484 }
 0xd48   :  { %v487_v57 = vmul.f32 %v485_v56, %v468_v50 }
 0xd4a   :  { %489 = vrot.lane.b32.xlu2 %v487_v57, %s835_s3 }
 0xda4   :  { %v490_v58 = vpop.permute.xlu2 %489 }
 0xda5   :  { %701 = vmatmul.msk.f32.vlgmr.msrb.gmra.mxu1 %vm111_vm5, %v490_v58 }
 0xe22   :  { %v510_v60 = vpop.f32.mrf.mxu1 }
 0xe23   :  { %v513_v61 = vadd.f32 %v510_v60, %v106_v59 }
 0xe25   :  { %765 = vtanh.f32 %v513_v61  ;;  %v702_v63 = vmul.f32 -1.442695, %v513_v61 }
 0xe27   :  { %767 = vpow2.f32 %v702_v63 }
 0xe2b   :  { %v766_v62 = vpop.eup %765 }
 0xe2c   :  { %536 = vrot.lane.b32.xlu0 %v766_v62, %s834_s17 }
 0xe2d   :  { %v768_v0 = vpop.eup %767 }
 0xe2e   :  { %v517_v1 = vadd.f32 1.0, %v768_v0 }
 0xe30   :  { %769 = vrcp.f32 %v517_v1  ;;  %v529_v7 = vand.u32 2147483648, %v517_v1  ;;  %vm523_vm12 = vweird.f32 %v517_v1  ;;  %v527_v41 = vand.u32 2147483647, %v517_v1 }
 0xe32   :  { %v530_v10 = vor.u32 1.1754944e-38, %v529_v7  ;;  %vm528_vm14 = vcmp.eq.f32.partialorder %v527_v41, 8.507059e+37 }
 0xe36   :  { %v770_v2 = vpop.eup %769 }
 0xe37   :  { %v519_v3 = vmul.f32 %v770_v2, %v517_v1  ;;  %vm524_vm11 = vweird.f32 %v770_v2 }
 0xe38   :  { %vm525_vm13 = vmor %vm523_vm12, %vm524_vm11 }
 0xe39   :  { %v520_v4 = vsub.f32 1.0, %v519_v3 }
 0xe3b   :  { %v521_v5 = vmul.f32 %v770_v2, %v520_v4 }
 0xe3d   :  { %v522_v6 = vadd.f32 %v770_v2, %v521_v5 }
 0xe3f   :  { %v526_v8 = vsel %vm525_vm13, %v770_v2, %v522_v6 }
 0xe40   :  { %v531_v13 = vsel %vm528_vm14, %v530_v10, %v526_v8 }
 0xe41   :  { %v534_v15 = vmul.f32 %v531_v13, %v481_v54 }
 0xe9e   :  { %v537_v12 = vpop.permute.xlu0 %536 }
 0xe9f   :  { %v539_v14 = vmul.f32 %v537_v12, %v531_v13 }
 0xea1   :  { %541 = vrot.lane.b32.xlu1 %v539_v14, %s835_s3 }
 0xf13   :  { %v542_v16 = vpop.permute.xlu1 %541 }
 0xf14   :  { %v544_v17 = vadd.f32 %v542_v16, %v534_v15 }
 0xf16   :  { %771 = vtanh.f32 %v544_v17 }
 0xf1c   :  { %v772_v18 = vpop.eup %771 }
 0xf1d   :  { %547 = vrot.lane.b32.xlu2 %v772_v18, %s834_s17 }
 0xf77   :  { %v548_v19 = vpop.permute.xlu2 %547 }
 0xf78   :  { %v550_v20 = vmul.f32 %v548_v19, %v531_v13 }
 0xf7a   :  { %552 = vrot.lane.b32.xlu0 %v550_v20, %s835_s3 }
 0xfec   :  { %v553_v21 = vpop.permute.xlu0 %552 }
 0xfed   :  { %703 = vmatmul.msk.f32.vlgmr.msrb.gmra.mxu2 %vm111_vm5, %v553_v21 }
0x1070   :  { %v573_v23 = vpop.f32.mrf.mxu2 }
0x1071   :  { %v576_v24 = vadd.f32 %v573_v23, %v109_v22 }
0x1073   :  { %773 = vtanh.f32 %v576_v24  ;;  %v704_v26 = vmul.f32 -1.442695, %v576_v24 }
0x1075   :  { %775 = vpow2.f32 %v704_v26 }
0x1079   :  { %v774_v25 = vpop.eup %773 }
0x107a   :  { %599 = vrot.lane.b32.xlu1 %v774_v25, %s834_s17 }
0x107b   :  { %v776_v27 = vpop.eup %775 }
0x107c   :  { %v580_v28 = vadd.f32 1.0, %v776_v27 }
0x107e   :  { %777 = vrcp.f32 %v580_v28  ;;  %v592_v34 = vand.u32 2147483648, %v580_v28  ;;  %vm586_vm1 = vweird.f32 %v580_v28  ;;  %v590_v11 = vand.u32 2147483647, %v580_v28 }
0x1080   :  { %v593_v35 = vor.u32 1.1754944e-38, %v592_v34  ;;  %vm591_vm0 = vcmp.eq.f32.partialorder %v590_v11, 8.507059e+37 }
0x1084   :  { %v778_v29 = vpop.eup %777 }
0x1085   :  { %v582_v30 = vmul.f32 %v778_v29, %v580_v28  ;;  %vm587_vm15 = vweird.f32 %v778_v29 }
0x1086   :  { %vm588_vm2 = vmor %vm586_vm1, %vm587_vm15 }
0x1087   :  { %v583_v31 = vsub.f32 1.0, %v582_v30 }
0x1089   :  { %v584_v32 = vmul.f32 %v778_v29, %v583_v31 }
0x108b   :  { %v585_v33 = vadd.f32 %v778_v29, %v584_v32 }
0x108d   :  { %v589_v42 = vsel %vm588_vm2, %v778_v29, %v585_v33 }
0x108e   :  { %v594_v37 = vsel %vm591_vm0, %v593_v35, %v589_v42 }
0x108f   :  { %v597_v39 = vmul.f32 %v594_v37, %v544_v17 }
0x10ec   :  { %v600_v36 = vpop.permute.xlu1 %599 }
0x10ed   :  { %v602_v38 = vmul.f32 %v600_v36, %v594_v37 }
0x10ef   :  { %604 = vrot.lane.b32.xlu2 %v602_v38, %s835_s3 }
0x1149   :  { %v605_v40 = vpop.permute.xlu2 %604 }
0x114a   :  { %v607_v43 = vadd.f32 %v605_v40, %v597_v39 }
0x114c   :  { %779 = vtanh.f32 %v607_v43 }
0x1152   :  { %v780_v44 = vpop.eup %779 }
0x1153   :  { %610 = vrot.lane.b32.xlu0 %v780_v44, %s834_s17 }
0x11c5   :  { %v611_v48 = vpop.permute.xlu0 %610 }
0x11c6   :  { %v613_v49 = vmul.f32 %v611_v48, %v594_v37 }
0x11c8   :  { %615 = vrot.lane.b32.xlu1 %v613_v49, %s835_s3  ;;  %s655_s3 = sshll.u32 %s837_s18, 4  ;;  %s656_s3 = int_to_ptr.vmem [resolvable:$true] %s655_s3 }
0x123a   :  { %v616_v50 = vpop.permute.xlu1 %615 }
0x123b   :  { %618 = vst.msk [vmem:[#allocation4] sm:$0xff] %vm111_vm5, %v616_v50  ;;  %705 = vmatmul.msk.f32.vlgmr.msra.gmra.mxu3 %vm111_vm5, %v616_v50 }
0x123c   :  { %671 = dma.vmem_to_hbm [thread:$0]  %s667_s14, 128, %s669_s16, [#allocation5]  }
0x12be   :  { %v646_v52 = vpop.f32.mrf.mxu3 }
0x12bf   :  { %v647_v53 = vadd.f32 %v716_v51, %v646_v52 }
0x12c1   :  { %649 = vst [vmem:[#allocation2] sm:$0xff] %v647_v53 }
0x12c2   :  { %660 = dma.vmem_to_hbm [thread:$0]  %s656_s3, 128, %s658_s21, [#allocation3]  }
0x12c3   :  { %829 = dma.done.wait [#allocation3], 128  }
0x12c4   :  { %830 = vsyncadd [#allocation3], 4294967168 }
0x12c5   :  { %831 = dma.done.wait [#allocation5], 128  }
0x12c6   :  { %832 = vsyncadd [#allocation5], 4294967168 }
0x12c7   :  { %680 = vsyncpa [#allocation3], 1 }
0x12c8   :  { %681 = vsyncpa [#allocation5], 1 }

</bundles_post_ra>
